<compile_context>
chip_gen: v6e
topology: v6e:2x2x1
jax: 0.10.0
libtpu: 0.0.40
codegen_flags: <defaults>
</compile_context>

<pallas_src>
import jax
import jax.numpy as jnp
from jax.experimental import pallas as pl
from jax.experimental.pallas import tpu as pltpu


def _round_up(x, m):
    return (x + m - 1) // m * m


def _cdiv(a, b):
    return (a + b - 1) // b


def _pad2d(a, rows, cols):
    """Zero-pad a 2-D array only when the shape actually requires it."""
    r, c = a.shape
    if r == rows and c == cols:
        return a
    return jnp.pad(a, ((0, rows - r), (0, cols - c)))


def _single_buffered_spec(block_shape, index_map):
    """Loop-invariant blocks don't need double-buffering; reclaim the VMEM.

    Falls back to the default (double-buffered) BlockSpec if this jax version
    does not support pipeline_mode / pl.Buffered.
    """
    try:
        return pl.BlockSpec(block_shape, index_map, pipeline_mode=pl.Buffered(1))
    except Exception:  # pragma: no cover - defensive fallback
        return pl.BlockSpec(block_shape, index_map)


def bengio_mlp_kernel(emb_ref, w1_ref, b1_ref, w2_ref, b2_ref, out_ref, h_ref):
    """Fused fc1 -> relu -> fc2 over a (batch tile, vocab tile) grid.

    fc1 + relu runs once per batch tile (gated on vocab-tile index 0) into the
    VMEM scratch h_ref (stored in the fc2 compute dtype so no per-vocab-step
    cast is needed); fc2 streams one W2 vocab tile per grid step.
    """
    @pl.when(pl.program_id(1) == 0)
    def _():
        h = jnp.dot(emb_ref[...], w1_ref[...],
                    preferred_element_type=jnp.float32)
        h = jnp.maximum(h + b1_ref[...].astype(jnp.float32), 0.0)
        h_ref[...] = h.astype(h_ref.dtype)      # one-time cast per batch tile

    logits = jnp.dot(h_ref[...], w2_ref[...],
                     preferred_element_type=jnp.float32)
    out_ref[...] = (logits + b2_ref[...].astype(jnp.float32)).astype(out_ref.dtype)


def bengio_forward(x, emb_table, w1, b1, w2, b2, *,
                   tile_m=256, tile_n=1024,
                   param_dtype=jnp.bfloat16, out_dtype=jnp.float32):
    """BengioNN forward. x: (B, context) int32 ids. Returns (B, vocab) logits.

    param_dtype=jnp.bfloat16 (default) streams weights/activations in bf16
    with f32 MXU accumulation; param_dtype=None keeps everything in f32 and
    matches the reference to tight tolerance.
    """
    B, C = x.shape
    E = emb_table.shape[1]
    in_feat = C * E
    hidden = w1.shape[1]
    vocab = w2.shape[1]

    if param_dtype is not None:
        emb_table = emb_table.astype(param_dtype)
        w1 = w1.astype(param_dtype)
        b1 = b1.astype(param_dtype)
        w2 = w2.astype(param_dtype)
        b2 = b2.astype(param_dtype)
    p_itemsize = jnp.dtype(w1.dtype).itemsize
    o_itemsize = jnp.dtype(out_dtype).itemsize

    # Embedding lookup + flatten (glue; not the matmul hot path at these sizes).
    embedded = jnp.take(emb_table, x, axis=0).reshape(B, in_feat)

    # --- tile / padding plan ---------------------------------------------
    in_feat_p = _round_up(in_feat, 128)
    hidden_p = _round_up(hidden, 128)
    tile_m = _round_up(min(tile_m, _round_up(B, 8)), 8)
    tile_n = _round_up(min(tile_n, _round_up(vocab, 128)), 128)

    # Generation-aware VMEM budget: ~48 MiB on v7x (64 MiB VMEM),
    # ~96 MiB on v5e/v6e (128 MiB VMEM).
    try:
        vmem_cap = int(pltpu.get_tpu_info().vmem_capacity_bytes)
    except Exception:  # pragma: no cover - conservative fallback
        vmem_cap = 64 * 1024 * 1024
    vmem_budget = vmem_cap * 3 // 4

    def _vmem_bytes(tm, tn):
        # embedded / W1 / b1 are single-buffered (loop-invariant within the
        # inner vocab loop); W2 / b2 / out tiles are double-buffered; the h
        # scratch lives in the compute (param) dtype.
        single = (tm * in_feat_p                # embedded tile
                  + in_feat_p * hidden_p       # W1 (whole)
                  + hidden_p) * p_itemsize     # b1
        dbl = 2 * ((hidden_p * tn + tn) * p_itemsize   # W2 tile + b2 tile
                   + tm * tn * o_itemsize)             # logits tile
        return single + dbl + tm * hidden_p * p_itemsize

    while tile_n > 128 and _vmem_bytes(tile_m, tile_n) > vmem_budget:
        tile_n = max(128, _round_up(tile_n // 2, 128))
    while tile_m > 8 and _vmem_bytes(tile_m, tile_n) > vmem_budget:
        tile_m = max(8, _round_up(tile_m // 2, 8))

    # Balance the "parallel" batch axis across v7x's 2 TensorCores: nudge the
    # batch-tile count to an even number so neither core sits idle.
    num_m = _cdiv(B, tile_m)
    if num_m > 1 and num_m % 2 == 1:
        num_m += 1
        tile_m = _round_up(_cdiv(B, num_m), 8)
    B_p = num_m * tile_m
    vocab_p = _round_up(vocab, tile_n)
    num_n = vocab_p // tile_n

    # Zero-pad to the tile plan (padded rows/cols contribute zeros through the
    # matmuls and are sliced off the result).  For production, pre-pad the
    # weights once outside the per-step call instead of here.
    emb_p = _pad2d(embedded, B_p, in_feat_p)
    w1_p = _pad2d(w1, in_feat_p, hidden_p)
    b1_p = _pad2d(b1.reshape(1, -1), 1, hidden_p)
    w2_p = _pad2d(w2, hidden_p, vocab_p)
    b2_p = _pad2d(b2.reshape(1, -1), 1, vocab_p)

    grid = (num_m, num_n)

    cost = pl.CostEstimate(
        flops=2 * B_p * (in_feat_p * hidden_p + hidden_p * vocab_p),
        transcendentals=0,
        bytes_accessed=(emb_p.size * p_itemsize
                        + w1_p.size * p_itemsize
                        + num_m * w2_p.size * p_itemsize   # W2 streamed per M-tile
                        + B_p * vocab_p * o_itemsize),
    )

    need = _vmem_bytes(tile_m, tile_n)
    vmem_limit = int(min(vmem_cap - 4 * 1024 * 1024,
                         max(need * 5 // 4, 32 * 1024 * 1024)))

    out_p = pl.pallas_call(
        bengio_mlp_kernel,
        out_shape=jax.ShapeDtypeStruct((B_p, vocab_p), out_dtype),
        grid_spec=pltpu.PrefetchScalarGridSpec(
            num_scalar_prefetch=0,
            grid=grid,
            in_specs=[
                # loop-invariant within the inner vocab loop -> single buffer
                _single_buffered_spec((tile_m, in_feat_p), lambda i, j: (i, 0)),
                _single_buffered_spec((in_feat_p, hidden_p), lambda i, j: (0, 0)),
                _single_buffered_spec((1, hidden_p), lambda i, j: (0, 0)),
                # streamed per vocab tile -> default double buffering
                pl.BlockSpec((hidden_p, tile_n), lambda i, j: (0, j)),
                pl.BlockSpec((1, tile_n), lambda i, j: (0, j)),
            ],
            out_specs=pl.BlockSpec((tile_m, tile_n), lambda i, j: (i, j)),
            # h scratch in the fc2 compute dtype (bf16 when streaming bf16).
            scratch_shapes=[pltpu.VMEM((tile_m, hidden_p), w2_p.dtype)],
        ),
        compiler_params=pltpu.CompilerParams(
            # Batch tiles are independent -> megacore / dual-TC sharding.
            # The vocab axis MUST stay innermost + sequential ("arbitrary"):
            # the fc1 scratch is only (re)computed when program_id(1) == 0.
            dimension_semantics=("parallel", "arbitrary"),
            vmem_limit_bytes=vmem_limit,
        ),
        cost_estimate=cost,
    )(emb_p, w1_p, b1_p, w2_p, b2_p)

    return out_p[:B, :vocab]


def reference_forward(x, emb_table, w1, b1, w2, b2):
    B = x.shape[0]
    embedded = jnp.take(emb_table, x, axis=0).reshape(B, -1)
    h = jnp.maximum(embedded @ w1 + b1, 0.0)
    return h @ w2 + b2


if __name__ == "__main__":
    # Small shapes consistent with the module's forward; deliberately NOT
    # 128-aligned (vocab=1000, hidden=96, batch=40) so padding/slicing and the
    # 2-D (batch, vocab) grid are actually exercised.
    vocab_size = 1000
    context_size = 4
    embed_size = 16
    hidden_dim = 96
    batch = 40

    key = jax.random.PRNGKey(0)
    k_emb, k_w1, k_b1, k_w2, k_b2, k_x = jax.random.split(key, 6)

    # Shapes match nn.Embedding / nn.Linear (biases 1-D like PyTorch).
    emb_table = jax.random.normal(k_emb, (vocab_size, embed_size), jnp.float32)
    w1 = jax.random.normal(k_w1, (context_size * embed_size, hidden_dim),
                           jnp.float32) * 0.1
    b1 = jax.random.normal(k_b1, (hidden_dim,), jnp.float32) * 0.1
    w2 = jax.random.normal(k_w2, (hidden_dim, vocab_size), jnp.float32) * 0.1
    b2 = jax.random.normal(k_b2, (vocab_size,), jnp.float32) * 0.1

    # Input: (batch, context_size) integer token ids.
    x = jax.random.randint(k_x, (batch, context_size), 0, vocab_size, jnp.int32)

    ref = jax.block_until_ready(
        reference_forward(x, emb_table, w1, b1, w2, b2))

    # Small tile_m so the batch axis of the grid is exercised at this size;
    # at production sizes leave the defaults (tile_m=256, tile_n=1024).

    # 1) Full-precision path: must match the reference tightly.
    logits_f32 = jax.block_until_ready(
        bengio_forward(x, emb_table, w1, b1, w2, b2,
                       tile_m=16, tile_n=512, param_dtype=None))
    assert logits_f32.shape == (batch, vocab_size)
    assert jnp.allclose(logits_f32, ref, atol=1e-4, rtol=1e-4)

    # 2) Default bf16-streamed path (f32 accumulate): looser tolerance.
    logits_bf16 = jax.block_until_ready(
        bengio_forward(x, emb_table, w1, b1, w2, b2,
                       tile_m=16, tile_n=512))
    assert logits_bf16.shape == (batch, vocab_size)
    assert jnp.allclose(logits_bf16, ref, atol=5e-2, rtol=5e-2)

    print("KERNEL_OK")
</pallas_src>

<mosaic_0001>
module attributes {stable_mosaic.version = 11 : i64} {
  func.func @bengio_mlp_kernel(%arg0: i32, %arg1: i32, %arg2: memref<16x128xf32, #tpu.memory_space<vmem>>, %arg3: memref<128x128xf32, #tpu.memory_space<vmem>>, %arg4: memref<1x128xf32, #tpu.memory_space<vmem>>, %arg5: memref<128x512xf32, #tpu.memory_space<vmem>>, %arg6: memref<1x512xf32, #tpu.memory_space<vmem>>, %arg7: memref<16x512xf32, #tpu.memory_space<vmem>>, %arg8: memref<16x128xf32, #tpu.memory_space<vmem>>) attributes {dimension_semantics = [#tpu.dimension_semantics<parallel>, #tpu.dimension_semantics<arbitrary>], iteration_bounds = array<i64: 4, 2>, scalar_prefetch = 0 : i64, scratch_operands = 1 : i64, tpu.core_type = #tpu.core_type<tc>, window_params = [{pipeline_mode = #tpu.pipeline_mode<synchronous>, transform_indices = @transform_0, window_bounds = array<i64: 16, 128>}, {pipeline_mode = #tpu.pipeline_mode<synchronous>, transform_indices = @transform_1, window_bounds = array<i64: 128, 128>}, {pipeline_mode = #tpu.pipeline_mode<synchronous>, transform_indices = @transform_2, window_bounds = array<i64: 1, 128>}, {transform_indices = @transform_3, window_bounds = array<i64: 128, 512>}, {transform_indices = @transform_4, window_bounds = array<i64: 1, 512>}, {transform_indices = @transform_5, window_bounds = array<i64: 16, 512>}]} {
    %c0_i32 = arith.constant 0 : i32
    %0 = arith.cmpi eq, %arg1, %c0_i32 : i32
    %1 = arith.extui %0 : i1 to i32
    %c0_i32_0 = arith.constant 0 : i32
    %2 = arith.cmpi ne, %1, %c0_i32_0 : i32
    scf.if %2 {
      %c0_8 = arith.constant 0 : index
      %c0_9 = arith.constant 0 : index
      %10 = vector.load %arg2[%c0_8, %c0_9] : memref<16x128xf32, #tpu.memory_space<vmem>>, vector<16x128xf32>
      %c0_10 = arith.constant 0 : index
      %c0_11 = arith.constant 0 : index
      %11 = vector.load %arg3[%c0_10, %c0_11] : memref<128x128xf32, #tpu.memory_space<vmem>>, vector<128x128xf32>
      %cst_12 = arith.constant dense<0.000000e+00> : vector<16x128xf32>
      %12 = tpu.matmul %10, %11, %cst_12 {dimension_numbers = #tpu.dot_dimension_numbers<[1], [0], [0], [1], [0, 0, 1, 1], [], []>} : vector<16x128xf32>, vector<128x128xf32>, vector<16x128xf32> -> vector<16x128xf32>
      %c0_13 = arith.constant 0 : index
      %c0_14 = arith.constant 0 : index
      %13 = vector.load %arg4[%c0_13, %c0_14] : memref<1x128xf32, #tpu.memory_space<vmem>>, vector<1x128xf32>
      %14 = vector.broadcast %13 : vector<1x128xf32> to vector<16x128xf32>
      %15 = arith.addf %12, %14 : vector<16x128xf32>
      %cst_15 = arith.constant 0.000000e+00 : f32
      %16 = vector.broadcast %cst_15 : f32 to vector<16x128xf32>
      %17 = arith.maximumf %15, %16 : vector<16x128xf32>
      %c0_16 = arith.constant 0 : index
      %c0_17 = arith.constant 0 : index
      %18 = vector.load %arg8[%c0_16, %c0_17] : memref<16x128xf32, #tpu.memory_space<vmem>>, vector<16x128xf32>
      tpu.vector_store %arg8[%c0_16, %c0_17], %17 {strides = array<i32>} : memref<16x128xf32, #tpu.memory_space<vmem>>, vector<16x128xf32>,
    } else {
    }
    %c0 = arith.constant 0 : index
    %c0_1 = arith.constant 0 : index
    %3 = vector.load %arg8[%c0, %c0_1] : memref<16x128xf32, #tpu.memory_space<vmem>>, vector<16x128xf32>
    %c0_2 = arith.constant 0 : index
    %c0_3 = arith.constant 0 : index
    %4 = vector.load %arg5[%c0_2, %c0_3] : memref<128x512xf32, #tpu.memory_space<vmem>>, vector<128x512xf32>
    %cst = arith.constant dense<0.000000e+00> : vector<16x512xf32>
    %5 = tpu.matmul %3, %4, %cst {dimension_numbers = #tpu.dot_dimension_numbers<[1], [0], [0], [1], [0, 0, 1, 1], [], []>} : vector<16x128xf32>, vector<128x512xf32>, vector<16x512xf32> -> vector<16x512xf32>
    %c0_4 = arith.constant 0 : index
    %c0_5 = arith.constant 0 : index
    %6 = vector.load %arg6[%c0_4, %c0_5] : memref<1x512xf32, #tpu.memory_space<vmem>>, vector<1x512xf32>
    %7 = vector.broadcast %6 : vector<1x512xf32> to vector<16x512xf32>
    %8 = arith.addf %5, %7 : vector<16x512xf32>
    %c0_6 = arith.constant 0 : index
    %c0_7 = arith.constant 0 : index
    %9 = vector.load %arg7[%c0_6, %c0_7] : memref<16x512xf32, #tpu.memory_space<vmem>>, vector<16x512xf32>
    tpu.vector_store %arg7[%c0_6, %c0_7], %8 {strides = array<i32>} : memref<16x512xf32, #tpu.memory_space<vmem>>, vector<16x512xf32>,
    return
  }
  func.func @transform_0(%arg0: i32, %arg1: i32) -> (i32, i32) {
    %c0_i32 = arith.constant 0 : i32
    %c0_i32_0 = arith.constant 0 : i32
    return %arg0, %c0_i32 : i32, i32
  }
  func.func @transform_1(%arg0: i32, %arg1: i32) -> (i32, i32) {
    %c0_i32 = arith.constant 0 : i32
    %c0_i32_0 = arith.constant 0 : i32
    %c0_i32_1 = arith.constant 0 : i32
    return %c0_i32, %c0_i32_0 : i32, i32
  }
  func.func @transform_2(%arg0: i32, %arg1: i32) -> (i32, i32) {
    %c0_i32 = arith.constant 0 : i32
    %c0_i32_0 = arith.constant 0 : i32
    %c0_i32_1 = arith.constant 0 : i32
    return %c0_i32, %c0_i32_0 : i32, i32
  }
  func.func @transform_3(%arg0: i32, %arg1: i32) -> (i32, i32) {
    %c0_i32 = arith.constant 0 : i32
    %c0_i32_0 = arith.constant 0 : i32
    return %c0_i32, %arg1 : i32, i32
  }
  func.func @transform_4(%arg0: i32, %arg1: i32) -> (i32, i32) {
    %c0_i32 = arith.constant 0 : i32
    %c0_i32_0 = arith.constant 0 : i32
    return %c0_i32, %arg1 : i32, i32
  }
  func.func @transform_5(%arg0: i32, %arg1: i32) -> (i32, i32) {
    %c0_i32 = arith.constant 0 : i32
    return %arg0, %arg1 : i32, i32
  }
}

</mosaic_0001>

<bundles_post_ra>
// kernel: tpu_custom_call.1
= control target key start
LH: loop header
LB: loop body
LE: loop exit
PB: predicated region body
PF: predicated region fallthrough
CT: control target
= control target key end

     0   :  { %s1795_s0 = inlined_call_operand.hbm [shape: f32[64,128], index: 0, kind: input, shape index: {}]   ;;  %s1796_s1 = inlined_call_operand.hbm [shape: f32[128,128], index: 1, kind: input, shape index: {}]   ;;  %s1797_s2 = inlined_call_operand.vmem [shape: f32[1,128], index: 2, kind: input, shape index: {}]   ;;  %s1798_s3 = inlined_call_operand.hbm [shape: f32[128,1024], index: 3, kind: input, shape index: {}]   ;;  %s1799_s4 = inlined_call_operand.hbm [shape: f32[1,1024], index: 4, kind: input, shape index: {}]   ;;  %s1800_s5 = inlined_call_operand.hbm [shape: f32[64,1024], index: 5, kind: output, shape index: {}]  }
   0x1   :  { %1821 = sst [smem:[#allocation26_spill]] %s1795_s0 }
   0x2   :  { %1822 = sst [smem:[#allocation27_spill]] %s1797_s2 }
   0x3   :  { %1823 = sst [smem:[#allocation28_spill]] %s1798_s3 }
   0x4   :  { %1824 = sst [smem:[#allocation29_spill]] %s1800_s5 }
   0x5   :  { %10 = vsyncpa [#allocation4], 0 }
   0x6   :  { %11 = vsyncpa [#allocation7], 0 }
   0x7   :  { %12 = vsyncpa [#allocation5], 0 }
   0x8   :  { %14 = vsyncpa [#allocation5 + $0x1], 0  ;;  %s1384_s18 = smov 0   ;;  %s1386_s19 = smov 0  }
   0x9   :  { %s1388_s20 = smov 0   ;;  %s1390_s21 = smov 0  }
   0xa   :  { %s1392_s22 = smov 0   ;;  %s1394_s23 = smov 0  }
   0xb   :  { %s1396_s24 = smov 0   ;;  %s1398_s25 = smov 0  }
   0xc   :  { %s1400_s26 = smov 0   ;;  %s1402_s27 = smov 0  }
   0xd   :  { %s1404_s28 = smov 0   ;;  %s1406_s29 = smov 0  }
   0xe   :  { %s1408_s30 = smov 0   ;;  %s1410_s6 = smov 0  }
   0xf LB: > { %1825 = sst [smem:[#allocation15_spill]] %s1286_s18  ;;  %s1451_s7 = sadd.s32 4294967295, %s1338_s6   ;;  %s1338_s6 = sphi %s1410_s6, %s20_s6   ;;  %s1334_s30 = sphi %s1408_s30, %s1873_s30   ;;  %s1330_s29 = sphi %s1406_s29, %s1884_s29   ;;  %s1326_s28 = sphi %s1404_s28, %s1871_s28   ;;  %s1322_s27 = sphi %s1402_s27, %s1883_s27   ;;  %s1318_s26 = sphi %s1400_s26, %s1882_s26   ;;  %s1314_s25 = sphi %s1398_s25, %s1881_s25   ;;  %s1310_s24 = sphi %s1396_s24, %s1869_s24   ;;  %s1306_s23 = sphi %s1394_s23, %s1880_s23   ;;  %s1302_s22 = sphi %s1392_s22, %s1879_s22   ;;  %s1298_s21 = sphi %s1390_s21, %s1878_s21   ;;  %s1294_s20 = sphi %s1388_s20, %s1877_s20   ;;  %s1290_s19 = sphi %s1386_s19, %s1876_s19   ;;  %s1286_s18 = sphi %s1384_s18, %s1875_s18  }
  0x10   : > { %1826 = sst [smem:[#allocation16_spill]] %s1314_s25  ;;  %s836_s8 = sadd.s32 4294967294, %s1338_s6  }
  0x11   : > { %1827 = sst [smem:[#allocation17_spill]] %s1322_s27  ;;  %p52_p0 = scmp.ne.s32.totalorder %s1314_s25, %s1310_s24 }
  0x12   : > { %1828 = sst [smem:[#allocation18_spill]] %s1326_s28  ;;  %p1804_p1 = scmp.eq.s32.totalorder %s1451_s7, 0 }
  0x13   : > { %1829 = sst [smem:[#allocation19_spill]] %s1334_s30  ;;  %p120_p2 = scmp.ne.s32.totalorder %s1302_s22, %s1298_s21 }
  0x14   : > { %p1460_p3 = por %p1804_p1, %p52_p0  ;;  %p171_p4 = scmp.ne.s32.totalorder %s1294_s20, %s1290_s19 }
  0x15   : > { %p1468_p5 = por %p120_p2, %p1804_p1  ;;  %p172_p6 = scmp.eq.s32.totalorder %s1451_s7, 7 }
  0x16   : > { %s1830_s10 = scalar_select %p1460_p3, 1, 0 }
  0x17   : > { %s1831_s11 = scalar_select %p1468_p5, 1, 0 }
  0x18   : > { %p177_p7 = scmp.ne.s32.totalorder %s1290_s19, %s1286_s18  ;;  %p178_p8 = scmp.eq.s32.totalorder %s836_s8, 7 }
  0x19   : > { %p1475_p9 = por %p172_p6, %p171_p4  ;;  %p837_p10 = scmp.ge.s32.totalorder %s1338_s6, 1 }
  0x1a   : > { %p1480_p11 = por %p178_p8, %p177_p7  ;;  %p185_p12 = scmp.lt.s32.totalorder %s1338_s6, 9 }
  0x1b   : > { %s1832_s12 = scalar_select %p1475_p9, 1, 0 }
  0x1c   : > { %s1834_s13 = scalar_select %p1480_p11, 1, 0 }
  0x1d   : > { %1833 = sst [smem:[#allocation20_spill]] %s1832_s12  ;;  %s862_s14 = sshll.u32 %s1326_s28, 8 }
  0x1e   : > { %1835 = sst [smem:[#allocation21_spill]] %s1834_s13  ;;  %p1486_p13 = pnand %p837_p10, %p185_p12 }
  0x1f   : > { %s1837_s0 = sld [smem:[#allocation26_spill]]  ;;  %s1340_s24 = smov [#allocation3]  }
  0x20   : > { %s1836_s15 = scalar_select %p1486_p13, 1, 0 }
  0x21   : > { %s200_s8 = sshll.u32 %s1340_s24, 4  ;;  %p1803_p0 = pneg %p1486_p13  ;;  %s201_s8 = int_to_ptr.vmem [resolvable:$true] %s200_s8 }
  0x23   : > { %p1502_p2 = pnand %p1803_p0, %p1460_p3 }
  0x25   : > { %s1493_s21 = scalar_lea.hbm %s1837_s0, %s862_s14  ;;  %p1078_p6 = pneg %p1502_p2 }
  0x26   : > { %s1076_s16 = scalar_lea.hbm %s1493_s21, 256  ;;  %s1081_s24 = scalar_lea.hbm %s1837_s0, 1024 }
  0x27   : > { %p1077_p4 = scmp.ne.s32.totalorder %s1493_s21, %s1076_s16  ;;  %p1082_p10 = scmp.lt.s32.totalorder %s1493_s21, %s1837_s0 }
  0x28   : > { %p1083_p12 = scmp.lt.s32.totalorder %s1081_s24, %s1076_s16 }
  0x29   : > { %p1079_p7 = pnand %p1078_p6, %p1077_p4 }
  0x2a   : > { %p1084_p0 = por %p1083_p12, %p1082_p10 }
  0x2b   : > { %p1080_p8 = pneg %p1079_p7 }
  0x2d   : > { %p1085_p1 = pnand %p1084_p0, %p1080_p8 }
  0x2f   : > { %1088 = shalt.err (!%p1085_p1)
}
  0x30   : > { %s1089_s18 = scalar_lea.vmem %s201_s8, 256  ;;  %p1097_p3 = scmp.lt.s32.totalorder %s201_s8, %s201_s8 }
  0x31   : > { %p1090_p11 = scmp.ne.s32.totalorder %s201_s8, %s1089_s18  ;;  %p1098_p13 = scmp.lt.s32.totalorder %s1089_s18, %s1089_s18 }
  0x33   : > { %p1092_p9 = pnand %p1090_p11, %p1078_p6  ;;  %p1099_p4 = por %p1098_p13, %p1097_p3 }
  0x35   : > { %p1093_p5 = pneg %p1092_p9 }
  0x37   : > { %p1100_p7 = pnand %p1099_p4, %p1093_p5 }
  0x39   : > { %1103 = shalt.err (!%p1100_p7)
}
  0x3a   : > { %s1813_s5 = smov 128   ;;  %s1814_s25 = smov 8  }
  0x3b   : > { %934 = dma.hbm_to_vmem [thread:$0]  (!%p1502_p2), %s1493_s21, 256, %s201_s8, [#allocation4], %s1813_s5, %s1813_s5, %s1814_s25  }
  0x3c   : > { %s29_s18 = sadd.s32 1, %s1330_s29  ;;  %s32_s13 = sadd.s32 1, %s1334_s30 }
  0x3d   : > { %p30_p1 = scmp.ge.s32.totalorder %s29_s18, 2  ;;  %s39_s16 = sadd.s32 1, %s1318_s26 }
  0x3e   : > { %s107_s14 = sadd.s32 1, %s1306_s23  ;;  %p114_p3 = scmp.ne.s32.totalorder %s1306_s23, %s1302_s22 }
  0x3f   : > { %s1886_s18 = smov (%p30_p1, %s29_s18), 0  ;;  %s1888_s13 = smov (!%p30_p1, %s32_s13), %s1334_s30 }
  0x40   : > { %1839 = sst [smem:[#allocation22_spill]] %s1886_s18  ;;  %s104_s9 = ssub.s32 %s1330_s29, %s1886_s18 }
  0x41   : > { %p34_p5 = scmp.ge.s32.totalorder %s1888_s13, 4  ;;  %p105_p9 = scmp.eq.s32.totalorder %s104_s9, 0 }
  0x42   : > { %p115_p11 = scmp.eq.s32.totalorder %s1338_s6, 0  ;;  %p950_p13 = scmp.lt.s32.totalorder %s1338_s6, 8 }
  0x43   : > { %s1890_s13 = smov (%p34_p5, %s1888_s13), 0  ;;  %s230_s5 = sand.u32 1, %s1338_s6  }
  0x44   : > { %1840 = sst [smem:[#allocation23_spill]] %s1890_s13  ;;  %s36_s8 = ssub.s32 %s1334_s30, %s1890_s13 }
  0x45   : > { %s1539_s21 = scalar_select %p105_p9, %s1306_s23, %s107_s14  }
  0x46   : > { %p1543_p0 = por %p115_p11, %p114_p3  ;;  %p37_p2 = scmp.eq.s32.totalorder %s36_s8, 0 }
  0x47   : > { %1841 = sst [smem:[#allocation24_spill]] %s1539_s21  ;;  %s158_s24 = sor.u32 %s104_s9, %s36_s8 }
  0x48   : > { %p159_p6 = scmp.eq.s32.totalorder %s158_s24, 0  ;;  %s1844_s0 = sadd.s32 1, %s1294_s20 }
  0x49   : > { %s1549_s25 = scalar_select %p37_p2, %s1318_s26, %s39_s16  }
  0x4a   : > { %s1554_s18 = scalar_select %p159_p6, %s1294_s20, %s1844_s0  }
  0x4b   : > { %1843 = sst [smem:[#allocation25_spill]] %s1549_s25  ;;  %s232_s12 = sand.u32 1, %s1306_s23  }
  0x4c   : > { %s842_s28 = sshll.u32 %s232_s12, 9  ;;  %s863_s14 = sshll.u32 %s1330_s29, 9 }
  0x4d   : > { %s1845_s3 = sld [smem:[#allocation28_spill]]  ;;  %s234_s2 = scalar_lea.vmem [#allocation8], %s842_s28 }
  0x4e   : > { %s241_s27 = sshll.u32 %s234_s2, 4  ;;  %p1567_p8 = pnand %p950_p13, %p1543_p0  ;;  %s242_s27 = int_to_ptr.vmem [resolvable:$true] %s241_s27 }
  0x4f   : > { %s1571_s0 = scalar_lea.sflag [#allocation4], %s230_s5  ;;  %s1117_s16 = scalar_lea.vmem %s242_s27, 8192 }
  0x50   : > { %p1106_p10 = pneg %p1567_p8  ;;  %p1118_p12 = scmp.ne.s32.totalorder %s242_s27, %s1117_s16 }
  0x51   : > { %s1343_s2 = smov [#allocation8]  }
  0x52   : > { %p1120_p4 = pnand %p1118_p12, %p1106_p10  ;;  %s1122_s28 = sshll.u32 %s1343_s2, 4  ;;  %s1123_s28 = int_to_ptr.vmem [resolvable:$false] %s1122_s28 }
  0x53   : > { %s240_s30 = scalar_lea.hbm %s1845_s3, %s863_s14  ;;  %s1124_s13 = scalar_lea.vmem %s1123_s28, 16384 }
  0x54   : > { %p1121_p7 = pneg %p1120_p4  ;;  %p1125_p1 = scmp.lt.s32.totalorder %s242_s27, %s1123_s28 }
  0x55   : > { %p1126_p3 = scmp.lt.s32.totalorder %s1124_s13, %s1117_s16 }
  0x57   : > { %p1127_p5 = por %p1126_p3, %p1125_p1 }
  0x59   : > { %p1128_p9 = pnand %p1127_p5, %p1121_p7 }
  0x5b   : > { %1131 = shalt.err (!%p1128_p9)
}
  0x5c   : > { %s1344_s21 = smov 1024   ;;  %s1345_s5 = smov 512  }
  0x5d   : > { %s1346_s8 = smov 32   ;;  %s1347_s17 = smov [#allocation6]  }
  0x5e   : > { %941 = dma.hbm_to_vmem [thread:$0]  (!%p1567_p8), %s240_s30, 8192, %s242_s27, %s1571_s0, %s1344_s21, %s1345_s5, %s1346_s8  }
  0x5f   : > { %s213_s24 = sshll.u32 %s1347_s17, 4  ;;  %p1847_p11 = scmp.eq.s32.totalorder %s1451_s7, 0  ;;  %s214_s24 = int_to_ptr.vmem [resolvable:$true] %s213_s24 }
  0x60   : > { %p1848_p13 = scmp.ne.s32.totalorder %s1836_s15, 0  ;;  %s845_s14 = sshll.u32 %s232_s12, 2 }
  0x61   : > { %s1143_s16 = scalar_lea.vmem %s214_s24, 2048  ;;  %p1151_p1 = scmp.lt.s32.totalorder %s214_s24, %s214_s24 }
  0x62   : > { %p1849_p0 = pneg %p1848_p13  ;;  %p1144_p12 = scmp.ne.s32.totalorder %s214_s24, %s1143_s16 }
  0x63   : > { %p1152_p3 = scmp.lt.s32.totalorder %s1143_s16, %s1143_s16 }
  0x64   : > { %p935_p2 = pnand %p1849_p0, %p1847_p11 }
  0x65   : > { %p1153_p5 = por %p1152_p3, %p1151_p1 }
  0x66   : > { %p1134_p6 = pneg %p935_p2 }
  0x68   : > { %p1146_p4 = pnand %p1144_p12, %p1134_p6 }
  0x6a   : > { %p1147_p7 = pneg %p1146_p4 }
  0x6c   : > { %p1154_p9 = pnand %p1153_p5, %p1147_p7 }
  0x6e   : > { %1157 = shalt.err (!%p1154_p9)
}
  0x6f   : > { %s1850_s27 = smov 8   ;;  %s1851_s30 = smov 128  }
  0x70   : > { %937 = dma.hbm_to_vmem [thread:$0]  (!%p935_p2), %s1796_s1, 2048, %s214_s24, [#allocation7], %s1851_s30, %s1851_s30, %s1850_s27  }
  0x71   : > { %s864_s12 = sshll.u32 %s1330_s29, 6  ;;  %s255_s13 = scalar_lea.vmem [#allocation9], %s845_s14 }
  0x72   : > { %s263_s21 = sshll.u32 %s255_s13, 4  ;;  %s261_s17 = scalar_lea.hbm %s1799_s4, %s864_s12  ;;  %s264_s21 = int_to_ptr.vmem [resolvable:$true] %s263_s21 }
  0x73   : > { %s1171_s16 = scalar_lea.vmem %s264_s21, 64  ;;  %s1348_s3 = smov [#allocation9]  }
  0x74   : > { %p1172_p11 = scmp.ne.s32.totalorder %s264_s21, %s1171_s16  ;;  %s1176_s25 = sshll.u32 %s1348_s3, 4  ;;  %s1177_s25 = int_to_ptr.vmem [resolvable:$false] %s1176_s25 }
  0x75   : > { %s1178_s2 = scalar_lea.vmem %s1177_s25, 128  ;;  %p1179_p12 = scmp.lt.s32.totalorder %s264_s21, %s1177_s25 }
  0x76   : > { %p1174_p0 = pnand %p1172_p11, %p1106_p10  ;;  %p1180_p2 = scmp.lt.s32.totalorder %s1178_s2, %s1171_s16 }
  0x78   : > { %p1175_p6 = pneg %p1174_p0  ;;  %p1181_p4 = por %p1180_p2, %p1179_p12 }
  0x7a   : > { %p1182_p7 = pnand %p1181_p4, %p1175_p6 }
  0x7c   : > { %1185 = shalt.err (!%p1182_p7)
}
  0x7d   : > { %944 = dma.hbm_to_vmem [thread:$0]  (!%p1567_p8), %s261_s17, 64, %s264_s21, %s1571_s0  }
  0x7e   : > { %272 = sbr.rel (%p1848_p13) target bundleno = 638 (0x27e), region = 40  ;;  %p1852_p1 = scmp.ne.s32.totalorder (!%p1848_p13), %s1830_s10, 0 }
  0x83   : > { %1269 = dma.done.wait (%p1852_p1), [#allocation4], 256  }
  0x84   : > { %1271 = vsyncadd (%p1852_p1), [#allocation4], 4294967040  ;;  %p1853_p10 = scmp.eq.s32.totalorder %s1451_s7, 0 }
  0x86   : > { %1273 = dma.done.wait (%p1853_p10), [#allocation7], 2048   ;;  %p1854_p3 = pmov %p1853_p10 }
  0x87   : > { %s282_s3 = sand.u32 1, %s1451_s7   ;;  %s284_s25 = sand.u32 1, %s1302_s22  }
  0x88   : > { %1275 = vsyncadd (%p1854_p3), [#allocation7], 4294965248  ;;  %s850_s9 = sshll.u32 %s284_s25, 9  ;;  %s283_s15 = scalar_lea.sflag [#allocation4], %s282_s3 }
  0x89   : > { %s1616_s0 = scalar_lea.vmem [#allocation8], %s850_s9  ;;  %p1855_p8 = scmp.ne.s32.totalorder %s1831_s11, 0 }
  0x8b   : > { %1277 = dma.done.wait (%p1855_p8), %s283_s15, 8256  }
  0x8c   : > { %1279 = vsyncadd (%p1855_p8), %s283_s15, 4294959040  ;;  %s1622_s10 = sshll.u32 %s284_s25, 2  ;;  %s324_s24 = sand.u32 1, %s1290_s19  }
  0x8d   : > { %s852_s14 = sshll.u32 %s324_s24, 6  ;;  %s295_s27 = scalar_lea.vmem [#allocation9], %s1622_s10 }
  0x8e   : > { %s1628_s7 = scalar_lea.vmem [#allocation10], %s852_s14  ;;  %s1856_s30 = sld [smem:[#allocation17_spill]] }
  0x94   : > { %p853_p13 = scmp.ne.s32.totalorder %s1856_s30, 0 }
  0x95   : > { %s1857_s12 = sld [smem:[#allocation27_spill]] (!%p853_p13) }
  0x96   : > { %335 = sbr.rel (%p853_p13) target bundleno = 388 (0x184), region = 60 }
  0x9b   : > { %v353_v0 = vld [vmem:[#allocation6 + $0x78] sm:$0xff]  ;;  %v352_v1 = vld [vmem:[#allocation6 + $0x70] sm:$0xff]  ;;  %v351_v2 = vld [vmem:[#allocation6 + $0x68] sm:$0xff] }
  0x9c   : > { %884 = vmatprep.subr.mxu0 %v353_v0  ;;  %v350_v3 = vld [vmem:[#allocation6 + $0x60] sm:$0xff]  ;;  %v336_v4 = vld [vmem:[#allocation3] sm:$0xff]  ;;  %v349_v5 = vld [vmem:[#allocation6 + $0x58] sm:$0xff] }
  0x9d   : > { %885 = vmatpush3.msra.mxu0 %v353_v0  ;;  %916 = vmatprep.mubr.f32.mxu0 %v336_v4  ;;  %v348_v6 = vld [vmem:[#allocation6 + $0x50] sm:$0xff]  ;;  %v347_v7 = vld [vmem:[#allocation6 + $0x48] sm:$0xff]  ;;  %v346_v8 = vld [vmem:[#allocation6 + $0x40] sm:$0xff] }
  0x9e   : > { %886 = vmatprep.subr.mxu0 %v352_v1  ;;  %v345_v9 = vld [vmem:[#allocation6 + $0x38] sm:$0xff]  ;;  %v344_v10 = vld [vmem:[#allocation6 + $0x30] sm:$0xff]  ;;  %v343_v11 = vld [vmem:[#allocation6 + $0x28] sm:$0xff] }
  0x9f   : > { %887 = vmatpush3.msra.mxu0 %v352_v1  ;;  %v342_v12 = vld [vmem:[#allocation6 + $0x20] sm:$0xff]  ;;  %v341_v13 = vld [vmem:[#allocation6 + $0x18] sm:$0xff]  ;;  %v340_v14 = vld [vmem:[#allocation6 + $0x10] sm:$0xff] }
  0xa0   : > { %888 = vmatprep.subr.mxu0 %v351_v2  ;;  %v339_v15 = vld [vmem:[#allocation6 + $0x8] sm:$0xff]  ;;  %v338_v16 = vld [vmem:[#allocation6] sm:$0xff]  ;;  %v337_v17 = vld [vmem:[#allocation3 + $0x8] sm:$0xff] }
  0xa1   : > { %889 = vmatpush3.msra.mxu0 %v351_v2  ;;  %v854_v18 = vld [vmem:[%s1857_s12] ss:$0 sm:$0xff] }
  0xa2   : > { %890 = vmatprep.subr.mxu0 %v350_v3 }
  0xa3   : > { %891 = vmatpush3.msra.mxu0 %v350_v3 }
  0xa4   : > { %892 = vmatprep.subr.mxu0 %v349_v5 }
  0xa5   : > { %893 = vmatpush3.msra.mxu0 %v349_v5 }
  0xa6   : > { %894 = vmatprep.subr.mxu0 %v348_v6 }
  0xa7   : > { %895 = vmatpush3.msra.mxu0 %v348_v6 }
  0xa8   : > { %896 = vmatprep.subr.mxu0 %v347_v7 }
  0xa9   : > { %897 = vmatpush3.msra.mxu0 %v347_v7 }
  0xaa   : > { %898 = vmatprep.subr.mxu0 %v346_v8 }
  0xab   : > { %899 = vmatpush3.msra.mxu0 %v346_v8 }
  0xac   : > { %900 = vmatprep.subr.mxu0 %v345_v9 }
  0xad   : > { %901 = vmatpush3.msra.mxu0 %v345_v9 }
  0xae   : > { %902 = vmatprep.subr.mxu0 %v344_v10 }
  0xaf   : > { %903 = vmatpush3.msra.mxu0 %v344_v10 }
  0xb0   : > { %904 = vmatprep.subr.mxu0 %v343_v11 }
  0xb1   : > { %905 = vmatpush3.msra.mxu0 %v343_v11 }
  0xb2   : > { %906 = vmatprep.subr.mxu0 %v342_v12 }
  0xb3   : > { %907 = vmatpush3.msra.mxu0 %v342_v12 }
  0xb4   : > { %908 = vmatprep.subr.mxu0 %v341_v13 }
  0xb5   : > { %909 = vmatpush3.msra.mxu0 %v341_v13 }
  0xb6   : > { %910 = vmatprep.subr.mxu0 %v340_v14 }
  0xb7   : > { %911 = vmatpush3.msra.mxu0 %v340_v14 }
  0xb8   : > { %912 = vmatprep.subr.mxu0 %v339_v15 }
  0xb9   : > { %913 = vmatpush3.msra.mxu0 %v339_v15 }
  0xba   : > { %914 = vmatprep.subr.mxu0 %v338_v16 }
  0xbb   : > { %915 = vmatpush3.msra.mxu0 %v338_v16 }
  0xbc   : > { %917 = vmatmul.mubr.f32.vlgmr.msra.gmra.mxu0 %v337_v17 }
 0x17c   : > { %v918_v19 = vpop.f32.mrf.mxu0 }
 0x17d   : > { %v433_v20 = vadd.f32 %v918_v19, %v854_v18 }
 0x17e   : > { %v427_v21 = vpop.f32.mrf.mxu0 }
 0x17f   : > { %v437_v22 = vmax.f32 %v433_v20, 0.0  ;;  %v428_v23 = vadd.f32 %v854_v18, %v427_v21 }
 0x181   : > { %439 = vst [vmem:[#allocation2 + $0x8] sm:$0xff] %v437_v22  ;;  %v436_v24 = vmax.f32 %v428_v23, 0.0 }
 0x183   : > { %438 = vst [vmem:[#allocation2] sm:$0xff] %v436_v24 }
 0x184 PF: > { %v503_v25 = vld [vmem:[%s1616_s0 + $0x1e8] sm:$0xff]  ;;  %v505_v26 = vld [vmem:[%s1616_s0 + $0x1f8] sm:$0xff]  ;;  %v502_v27 = vld [vmem:[%s1616_s0 + $0x1e0] sm:$0xff]  ;;  %s1858_s13 = sld [smem:[#allocation17_spill]]  ;;  %s707_s2 = sshll.u32 %s1628_s7, 4  ;;  %s1712_s2 = int_to_ptr.vmem [resolvable:$true] %s707_s2 }
 0x185   : > { %528 = vmatprep.subr.mxu0 %v503_v25  ;;  %605 = vmatprep.subr.mxu1 %v505_v26  ;;  %v504_v28 = vld [vmem:[%s1616_s0 + $0x1f0] sm:$0xff]  ;;  %v499_v29 = vld [vmem:[%s1616_s0 + $0x1c8] sm:$0xff]  ;;  %v501_v30 = vld [vmem:[%s1616_s0 + $0x1d8] sm:$0xff]  ;;  %v1349_v26 = vmov 0.0   ;;  %s1859_s21 = sld [smem:[#allocation18_spill]]  ;;  %s1720_s10 = scalar_lea.sflag [#allocation5], %s324_s24 }
 0x186   : > { %529 = vmatpush1.msra.mxu0 %v502_v27  ;;  %606 = vmatpush1.msra.mxu1 %v504_v28  ;;  %v498_v31 = vld [vmem:[%s1616_s0 + $0x1c0] sm:$0xff]  ;;  %v500_v32 = vld [vmem:[%s1616_s0 + $0x1d0] sm:$0xff]  ;;  %v495_v33 = vld [vmem:[%s1616_s0 + $0x1a8] sm:$0xff]  ;;  %v508_v28 = vlaneseq  ;;  %s1860_s3 = sld [smem:[#allocation20_spill]]  ;;  %s1186_s14 = scalar_lea.vmem %s1712_s2, 1024 }
 0x187   : > { %530 = vmatprep.subr.mxu0 %v499_v29  ;;  %607 = vmatprep.subr.mxu1 %v501_v30  ;;  %v497_v34 = vld [vmem:[%s1616_s0 + $0x1b8] sm:$0xff]  ;;  %v494_v35 = vld [vmem:[%s1616_s0 + $0x1a0] sm:$0xff]  ;;  %v496_v36 = vld [vmem:[%s1616_s0 + $0x1b0] sm:$0xff]  ;;  %s1861_s15 = sld [smem:[#allocation29_spill]]  ;;  %p1187_p5 = scmp.ne.s32.totalorder %s1712_s2, %s1186_s14 }
 0x188   : > { %531 = vmatpush1.msra.mxu0 %v498_v31  ;;  %608 = vmatpush1.msra.mxu1 %v500_v32  ;;  %v491_v37 = vld [vmem:[%s1616_s0 + $0x188] sm:$0xff]  ;;  %v493_v38 = vld [vmem:[%s1616_s0 + $0x198] sm:$0xff]  ;;  %v490_v39 = vld [vmem:[%s1616_s0 + $0x180] sm:$0xff]  ;;  %v509_v29 = vshrl.u32 %v508_v28, 7 }
 0x189   : > { %532 = vmatprep.subr.mxu0 %v495_v33  ;;  %609 = vmatprep.subr.mxu1 %v497_v34  ;;  %v492_v40 = vld [vmem:[%s1616_s0 + $0x190] sm:$0xff]  ;;  %v487_v41 = vld [vmem:[%s1616_s0 + $0x168] sm:$0xff]  ;;  %v489_v42 = vld [vmem:[%s1616_s0 + $0x178] sm:$0xff] }
 0x18a   : > { %533 = vmatpush1.msra.mxu0 %v494_v35  ;;  %610 = vmatpush1.msra.mxu1 %v496_v36  ;;  %v486_v43 = vld [vmem:[%s1616_s0 + $0x160] sm:$0xff]  ;;  %v488_v44 = vld [vmem:[%s1616_s0 + $0x170] sm:$0xff]  ;;  %v483_v45 = vld [vmem:[%s1616_s0 + $0x148] sm:$0xff]  ;;  %v510_v30 = vsub.s32 0, %v509_v29  ;;  %v518_v31 = vsub.s32 2, %v509_v29  ;;  %v514_v33 = vsub.s32 1, %v509_v29 }
 0x18b   : > { %534 = vmatprep.subr.mxu0 %v491_v37  ;;  %611 = vmatprep.subr.mxu1 %v493_v38  ;;  %v485_v46 = vld [vmem:[%s1616_s0 + $0x158] sm:$0xff]  ;;  %v482_v47 = vld [vmem:[%s1616_s0 + $0x140] sm:$0xff]  ;;  %v484_v48 = vld [vmem:[%s1616_s0 + $0x150] sm:$0xff]  ;;  %v522_v34 = vsub.s32 3, %v509_v29  ;;  %s857_s5 = sshll.u32 %s1858_s13, 2  ;;  %s865_s8 = sshll.u32 %s1859_s21, 4 }
 0x18c   : > { %535 = vmatpush1.msra.mxu0 %v490_v39  ;;  %612 = vmatpush1.msra.mxu1 %v492_v40  ;;  %v479_v49 = vld [vmem:[%s1616_s0 + $0x128] sm:$0xff]  ;;  %v481_v50 = vld [vmem:[%s1616_s0 + $0x138] sm:$0xff]  ;;  %v478_v51 = vld [vmem:[%s1616_s0 + $0x120] sm:$0xff]  ;;  %s704_s17 = sadd.s32 %s865_s8, %s857_s5  ;;  %p1862_p9 = scmp.ne.s32.totalorder %s1860_s3, 0 }
 0x18d   : > { %536 = vmatprep.subr.mxu0 %v487_v41  ;;  %613 = vmatprep.subr.mxu1 %v489_v42  ;;  %v480_v52 = vld [vmem:[%s1616_s0 + $0x130] sm:$0xff]  ;;  %v475_v53 = vld [vmem:[%s1616_s0 + $0x108] sm:$0xff]  ;;  %v477_v54 = vld [vmem:[%s1616_s0 + $0x118] sm:$0xff]  ;;  %s859_s16 = sshll.u32 %s704_s17, 7 }
 0x18e   : > { %537 = vmatpush1.msra.mxu0 %v486_v43  ;;  %614 = vmatpush1.msra.mxu1 %v488_v44  ;;  %v474_v55 = vld [vmem:[%s1616_s0 + $0x100] sm:$0xff]  ;;  %v476_v56 = vld [vmem:[%s1616_s0 + $0x110] sm:$0xff]  ;;  %v471_v57 = vld [vmem:[%s1616_s0 + $0xe8] sm:$0xff]  ;;  %p1188_p11 = pnand %p1187_p5, %p1862_p9 }
 0x18f   : > { %538 = vmatprep.subr.mxu0 %v483_v45  ;;  %615 = vmatprep.subr.mxu1 %v485_v46  ;;  %v473_v58 = vld [vmem:[%s1616_s0 + $0xf8] sm:$0xff]  ;;  %v470_v59 = vld [vmem:[%s1616_s0 + $0xe0] sm:$0xff]  ;;  %v472_v60 = vld [vmem:[%s1616_s0 + $0xf0] sm:$0xff] }
 0x190   : > { %539 = vmatpush1.msra.mxu0 %v482_v47  ;;  %616 = vmatpush1.msra.mxu1 %v484_v48  ;;  %v467_v61 = vld [vmem:[%s1616_s0 + $0xc8] sm:$0xff]  ;;  %v469_v62 = vld [vmem:[%s1616_s0 + $0xd8] sm:$0xff]  ;;  %v466_v63 = vld [vmem:[%s1616_s0 + $0xc0] sm:$0xff]  ;;  %p1189_p0 = pneg %p1188_p11 }
 0x191   : > { %540 = vmatprep.subr.mxu0 %v479_v49  ;;  %617 = vmatprep.subr.mxu1 %v481_v50  ;;  %v468_v0 = vld [vmem:[%s1616_s0 + $0xd0] sm:$0xff]  ;;  %v463_v1 = vld [vmem:[%s1616_s0 + $0xa8] sm:$0xff]  ;;  %v465_v2 = vld [vmem:[%s1616_s0 + $0xb8] sm:$0xff] }
 0x192   : > { %541 = vmatpush1.msra.mxu0 %v478_v51  ;;  %618 = vmatpush1.msra.mxu1 %v480_v52  ;;  %v462_v3 = vld [vmem:[%s1616_s0 + $0xa0] sm:$0xff]  ;;  %v464_v4 = vld [vmem:[%s1616_s0 + $0xb0] sm:$0xff]  ;;  %v459_v5 = vld [vmem:[%s1616_s0 + $0x88] sm:$0xff] }
 0x193   : > { %542 = vmatprep.subr.mxu0 %v475_v53  ;;  %619 = vmatprep.subr.mxu1 %v477_v54  ;;  %v461_v6 = vld [vmem:[%s1616_s0 + $0x98] sm:$0xff]  ;;  %v458_v7 = vld [vmem:[%s1616_s0 + $0x80] sm:$0xff]  ;;  %v460_v8 = vld [vmem:[%s1616_s0 + $0x90] sm:$0xff] }
 0x194   : > { %543 = vmatpush1.msra.mxu0 %v474_v55  ;;  %620 = vmatpush1.msra.mxu1 %v476_v56  ;;  %v455_v9 = vld [vmem:[%s1616_s0 + $0x68] sm:$0xff]  ;;  %v457_v10 = vld [vmem:[%s1616_s0 + $0x78] sm:$0xff]  ;;  %v454_v11 = vld [vmem:[%s1616_s0 + $0x60] sm:$0xff] }
 0x195   : > { %544 = vmatprep.subr.mxu0 %v471_v57  ;;  %621 = vmatprep.subr.mxu1 %v473_v58  ;;  %v456_v12 = vld [vmem:[%s1616_s0 + $0x70] sm:$0xff]  ;;  %v451_v13 = vld [vmem:[%s1616_s0 + $0x48] sm:$0xff]  ;;  %v453_v14 = vld [vmem:[%s1616_s0 + $0x58] sm:$0xff] }
 0x196   : > { %545 = vmatpush1.msra.mxu0 %v470_v59  ;;  %622 = vmatpush1.msra.mxu1 %v472_v60  ;;  %v450_v15 = vld [vmem:[%s1616_s0 + $0x40] sm:$0xff]  ;;  %v452_v16 = vld [vmem:[%s1616_s0 + $0x50] sm:$0xff]  ;;  %v447_v17 = vld [vmem:[%s1616_s0 + $0x28] sm:$0xff] }
 0x197   : > { %546 = vmatprep.subr.mxu0 %v467_v61  ;;  %623 = vmatprep.subr.mxu1 %v469_v62  ;;  %v449_v18 = vld [vmem:[%s1616_s0 + $0x38] sm:$0xff]  ;;  %v446_v19 = vld [vmem:[%s1616_s0 + $0x20] sm:$0xff]  ;;  %v448_v20 = vld [vmem:[%s1616_s0 + $0x30] sm:$0xff] }
 0x198   : > { %547 = vmatpush1.msra.mxu0 %v466_v63  ;;  %624 = vmatpush1.msra.mxu1 %v468_v0  ;;  %v443_v21 = vld [vmem:[%s1616_s0 + $0x8] sm:$0xff]  ;;  %v445_v22 = vld [vmem:[%s1616_s0 + $0x18] sm:$0xff]  ;;  %v442_v23 = vld [vmem:[%s1616_s0] sm:$0xff] }
 0x199   : > { %548 = vmatprep.subr.mxu0 %v463_v1  ;;  %625 = vmatprep.subr.mxu1 %v465_v2  ;;  %v444_v24 = vld [vmem:[%s1616_s0 + $0x10] sm:$0xff]  ;;  %v440_v25 = vld [vmem:[#allocation2] sm:$0xff]  ;;  %v441_v27 = vld [vmem:[#allocation2 + $0x8] sm:$0xff]  ;;  %s1710_s0 = scalar_lea.hbm %s1861_s15, %s859_s16 }
 0x19a   : > { %549 = vmatpush1.msra.mxu0 %v462_v3  ;;  %626 = vmatpush1.msra.mxu1 %v464_v4  ;;  %v506_v32 = vld [vmem:[%s295_s27] sm:$0xf]  ;;  %s1350_s27 = smov [#allocation10]  }
 0x19b   : > { %550 = vmatprep.subr.mxu0 %v459_v5  ;;  %627 = vmatprep.subr.mxu1 %v461_v6  ;;  %v511_v35 = vrot.slane %v506_v32, %v510_v30  ;;  %v519_v36 = vrot.slane %v506_v32, %v518_v31  ;;  %v515_v37 = vrot.slane %v506_v32, %v514_v33  ;;  %s1190_s30 = sshll.u32 %s1350_s27, 4  ;;  %s1191_s30 = int_to_ptr.vmem [resolvable:$false] %s1190_s30 }
 0x19c   : > { %551 = vmatpush1.msra.mxu0 %v458_v7  ;;  %628 = vmatpush1.msra.mxu1 %v460_v8  ;;  %v523_v38 = vrot.slane %v506_v32, %v522_v34  ;;  %s1192_s11 = scalar_lea.vmem %s1191_s30, 2048  ;;  %p1193_p6 = scmp.lt.s32.totalorder %s1712_s2, %s1191_s30 }
 0x19d   : > { %552 = vmatprep.subr.mxu0 %v455_v9  ;;  %629 = vmatprep.subr.mxu1 %v457_v10  ;;  %p1194_p12 = scmp.lt.s32.totalorder %s1192_s11, %s1186_s14 }
 0x19e   : > { %553 = vmatpush1.msra.mxu0 %v454_v11  ;;  %630 = vmatpush1.msra.mxu1 %v456_v12 }
 0x19f   : > { %554 = vmatprep.subr.mxu0 %v451_v13  ;;  %631 = vmatprep.subr.mxu1 %v453_v14  ;;  %p1195_p2 = por %p1194_p12, %p1193_p6 }
 0x1a0   : > { %555 = vmatpush1.msra.mxu0 %v450_v15  ;;  %632 = vmatpush1.msra.mxu1 %v452_v16 }
 0x1a1   : > { %556 = vmatprep.subr.mxu0 %v447_v17  ;;  %633 = vmatprep.subr.mxu1 %v449_v18  ;;  %p1196_p4 = pnand %p1195_p2, %p1189_p0 }
 0x1a2   : > { %557 = vmatpush1.msra.mxu0 %v446_v19  ;;  %634 = vmatpush1.msra.mxu1 %v448_v20 }
 0x1a3   : > { %558 = vmatprep.subr.mxu0 %v443_v21  ;;  %635 = vmatprep.subr.mxu1 %v445_v22 }
 0x1a4   : > { %559 = vmatpush1.msra.mxu0 %v442_v23  ;;  %592 = vmatprep.mubr.f32.mxu0 %v1349_v26 }
 0x1a5   : > { %636 = vmatpush1.msra.mxu1 %v444_v24  ;;  %669 = vmatprep.mubr.f32.mxu1 %v1349_v26 }
 0x1a6   : > { %593 = vmatmul.mubr.f32.vlgmr.msra.gmra.mxu0 %v440_v25  ;;  %670 = vmatmul.mubr.f32.vlgmr.msra.gmra.mxu1 %v440_v25 }
 0x1a7   : > { %598 = vmatprep.mubr.f32.mxu0 %v1349_v26  ;;  %675 = vmatprep.mubr.f32.mxu1 %v1349_v26 }
 0x1aa   : > { %599 = vmatmul.mubr.f32.gmra.mxu0 %v441_v27  ;;  %676 = vmatmul.mubr.f32.gmra.mxu1 %v441_v27 }
 0x266   : > { %v594_v39 = vpop.f32.mrf.mxu0  ;;  %v671_v40 = vpop.f32.mrf.mxu1 }
 0x267   : > { %v595_v41 = vadd.f32 %v594_v39, %v511_v35  ;;  %v672_v42 = vadd.f32 %v671_v40, %v519_v36 }
 0x268   : > { %v596_v43 = vpop.f32.mrf.mxu0  ;;  %v673_v44 = vpop.f32.mrf.mxu1 }
 0x269   : > { %682 = vst [vmem:[%s1628_s7] sm:$0xff] %v595_v41  ;;  %684 = vst [vmem:[%s1628_s7 + $0x10] sm:$0xff] %v672_v42  ;;  %v597_v45 = vadd.f32 %v596_v43, %v515_v37  ;;  %v674_v46 = vadd.f32 %v673_v44, %v523_v38 }
 0x26a   : > { %v600_v47 = vpop.f32.mrf.mxu0  ;;  %v677_v48 = vpop.f32.mrf.mxu1 }
 0x26b   : > { %683 = vst [vmem:[%s1628_s7 + $0x8] sm:$0xff] %v597_v45  ;;  %685 = vst [vmem:[%s1628_s7 + $0x18] sm:$0xff] %v674_v46  ;;  %v601_v49 = vadd.f32 %v600_v47, %v511_v35  ;;  %v678_v50 = vadd.f32 %v677_v48, %v519_v36 }
 0x26c   : > { %v602_v51 = vpop.f32.mrf.mxu0  ;;  %v679_v52 = vpop.f32.mrf.mxu1 }
 0x26d   : > { %686 = vst [vmem:[%s1628_s7 + $0x20] sm:$0xff] %v601_v49  ;;  %688 = vst [vmem:[%s1628_s7 + $0x30] sm:$0xff] %v678_v50  ;;  %v603_v53 = vadd.f32 %v602_v51, %v515_v37  ;;  %v680_v54 = vadd.f32 %v679_v52, %v523_v38 }
 0x26f   : > { %687 = vst [vmem:[%s1628_s7 + $0x28] sm:$0xff] %v603_v53  ;;  %689 = vst [vmem:[%s1628_s7 + $0x38] sm:$0xff] %v680_v54 }
 0x270   : > { %1199 = shalt.err (!%p1196_p4)
}
 0x271   : > { %s1200_s24 = scalar_lea.hbm %s1710_s0, 1024  ;;  %s1204_s12 = scalar_lea.hbm %s1861_s15, 8192 }
 0x272   : > { %p1201_p7 = scmp.ne.s32.totalorder %s1710_s0, %s1200_s24  ;;  %p1205_p3 = scmp.lt.s32.totalorder %s1710_s0, %s1861_s15 }
 0x273   : > { %p1206_p8 = scmp.lt.s32.totalorder %s1204_s12, %s1200_s24 }
 0x274   : > { %p1202_p1 = pnand %p1201_p7, %p1862_p9 }
 0x275   : > { %p1207_p13 = por %p1206_p8, %p1205_p3 }
 0x276   : > { %p1203_p10 = pneg %p1202_p1 }
 0x278   : > { %p1208_p5 = pnand %p1207_p13, %p1203_p10 }
 0x27a   : > { %1211 = shalt.err (!%p1208_p5)
}
 0x27b   : > { %s1351_s5 = smov 512   ;;  %s1352_s8 = smov 1024  }
 0x27c   : > { %s1353_s17 = smov 32  }
 0x27d   : > { %929 = dma.vmem_to_hbm [thread:$0]  (%p1862_p9), %s1712_s2, 1024, %s1710_s0, %s1720_s10, %s1351_s5, %s1352_s8, %s1353_s17  }
 0x27e PF: > { %s1863_s16 = sld [smem:[#allocation15_spill]]  ;;  %p952_p11 = scmp.ge.s32.totalorder %s1338_s6, 2 }
 0x27f   : > { %s1864_s25 = sld [smem:[#allocation21_spill]] }
 0x284   : > { %s722_s9 = sand.u32 1, %s1863_s16  }
 0x285   : > { %p1865_p0 = scmp.ne.s32.totalorder %s1864_s25, 0  ;;  %s723_s14 = scalar_lea.sflag [#allocation5], %s722_s9 }
 0x287   : > { %p946_p6 = pnand %p952_p11, %p1865_p0 }
 0x289   : > { %p947_p12 = pneg %p946_p6 }
 0x28b   : > { %1281 = dma.done.wait (%p947_p12), %s723_s14, 1024  }
 0x28c   : > { %1283 = vsyncadd (%p947_p12), %s723_s14, 4294966272  ;;  %s20_s6 = sadd.s32 1, %s1338_s6   ;;  %s1867_s2 = smov %s1554_s18 }
 0x28d   : > { %p1748_p2 = scmp.ge.s32.totalorder %s20_s6, 10   ;;  %s1868_s3 = sld [smem:[#allocation24_spill]] }
 0x28e   : > { %s1869_s24 = sld [smem:[#allocation16_spill]]  ;;  %s1875_s18 = smov %s1290_s19 }
 0x28f   : > { %s1870_s0 = sld [smem:[#allocation25_spill]]  ;;  %s1876_s19 = smov %s1294_s20 }
 0x290   : > { %s1871_s28 = sld [smem:[#allocation19_spill]]  ;;  %s1877_s20 = smov %s1867_s2 }
 0x291   : > { %s1872_s10 = sld [smem:[#allocation22_spill]]  ;;  %s1878_s21 = smov %s1302_s22 }
 0x292   : > { %s1873_s30 = sld [smem:[#allocation23_spill]]  ;;  %s1879_s22 = smov %s1306_s23 }
 0x293   : > { %s1880_s23 = smov %s1868_s3  ;;  %s1881_s25 = smov %s1318_s26 }
 0x294   : > { %s1883_s27 = smov %s1330_s29  ;;  %19 = sbr.rel (!%p1748_p2) target bundleno = 15 (0xf), region = 108 }
 0x295   : > { %s1882_s26 = smov %s1870_s0 }
 0x297   : > { %s1884_s29 = smov %s1872_s10 }
 0x299   :  { %728 = vsyncpa [#allocation4], 1 }
 0x29a   :  { %730 = vsyncpa [#allocation4 + $0x1], 1 }
 0x29b   :  { %731 = vsyncpa [#allocation7], 1 }
 0x29c   :  { %732 = vsyncpa [#allocation5], 1 }
 0x29d   :  { %734 = vsyncpa [#allocation5 + $0x1], 1 }

</bundles_post_ra>
